<compile_context>
chip_gen: v5e
topology: v5e:2x2
jax: 0.10.0
libtpu: 0.0.40
codegen_flags: <defaults>
</compile_context>

<pallas_src>
import functools
import math

import jax
import jax.numpy as jnp
from jax.experimental import pallas as pl
from jax.experimental.pallas import tpu as pltpu


_INV_SQRT2 = 0.7071067811865476


def _round_up(x, m):
    return ((x + m - 1) // m) * m


def _vmem_capacity_bytes():
    """Physical per-TensorCore VMEM; conservative fallback if the query fails."""
    try:
        info = pltpu.get_tpu_info()
        cap = int(getattr(info, "vmem_capacity_bytes", 0) or 0)
        if cap > 0:
            return cap
    except Exception:
        pass
    return 64 << 20  # v7x is the smallest (64 MiB/TC) — safe default


def _pick_tf(ffn_p, target):
    """Largest multiple of 128 that divides ffn_p and is <= target."""
    best = 128
    k = 1
    while 128 * k <= min(target, ffn_p):
        if ffn_p % (128 * k) == 0:
            best = 128 * k
        k += 1
    return best


def _mlp_kernel(x_ref, w1_ref, b1_ref, w2_ref, b2_ref, o_ref, acc_ref, *,
                approx_gelu):
    f = pl.program_id(1)

    @pl.when(f == 0)
    def _init():
        acc_ref[...] = jnp.zeros_like(acc_ref)

    # ---- Linear 1 on this ffn slice (MXU, f32 accumulation) ----
    x = x_ref[...].astype(w1_ref.dtype)        # in-tile cast: no extra HBM pass
    h = jnp.dot(x, w1_ref[...], preferred_element_type=jnp.float32)
    h = h + b1_ref[...].astype(jnp.float32)    # (TM, TF) + (1, TF) broadcast

    # ---- GELU in f32 ----
    if approx_gelu:
        h = jax.nn.gelu(h, approximate=True)                      # tanh -> EUP
    else:
        h = 0.5 * h * (1.0 + jax.lax.erf(h * jnp.float32(_INV_SQRT2)))  # exact

    # ---- Linear 2 partial product, accumulated over ffn tiles ----
    h = h.astype(w2_ref.dtype)
    acc_ref[...] += jnp.dot(h, w2_ref[...], preferred_element_type=jnp.float32)

    # ---- Finalize: bias2 + cast on the last ffn step ----
    @pl.when(f == pl.num_programs(1) - 1)
    def _done():
        o_ref[...] = (acc_ref[...] + b2_ref[...].astype(jnp.float32)
                      ).astype(o_ref.dtype)


def prepare_params(w1, b1, w2, b2, *, compute_dtype=None):
    """One-time prep (hoisted out of the per-call path): pad ffn/out dims to
    lane-dense multiples of 128, reshape biases to (1, F), and optionally cast
    the weights to the MXU operand dtype (jnp.bfloat16 recommended on v6e/v7x).
    Zero padding is exact for this op (GELU(0)=0, padded rows/cols are zero).
    Biases stay f32 so bias-add / GELU stay in f32.
    """
    hidden, ffn = w1.shape
    out_dim = w2.shape[1]
    ffn_p = _round_up(ffn, 128)
    out_p = _round_up(out_dim, 128)

    if compute_dtype is not None:
        w1 = w1.astype(compute_dtype)
        w2 = w2.astype(compute_dtype)

    if ffn_p != ffn:
        w1 = jnp.pad(w1, ((0, 0), (0, ffn_p - ffn)))
        b1 = jnp.pad(b1, (0, ffn_p - ffn))
    if ffn_p != ffn or out_p != out_dim:
        w2 = jnp.pad(w2, ((0, ffn_p - ffn), (0, out_p - out_dim)))
    if out_p != out_dim:
        b2 = jnp.pad(b2, (0, out_p - out_dim))

    return dict(w1=w1, b1=b1.reshape(1, ffn_p), w2=w2, b2=b2.reshape(1, out_p),
                hidden=hidden, out_dim=out_dim)


def mlp_layer(x, params, *, tm=None, tf=None, approx_gelu=False):
    """x: (..., hidden). params: output of prepare_params(). Returns (..., out)."""
    w1, b1, w2, b2 = params["w1"], params["b1"], params["w2"], params["b2"]
    hidden, out_dim = params["hidden"], params["out_dim"]
    assert x.shape[-1] == hidden
    ffn_p, out_p = w1.shape[1], w2.shape[1]

    lead_shape = x.shape[:-1]
    m = math.prod(lead_shape) if lead_shape else 1
    out_dtype = x.dtype
    x2d = x.reshape(m, hidden)

    bpw = jnp.dtype(w1.dtype).itemsize
    bpx = jnp.dtype(x.dtype).itemsize
    bpb = jnp.dtype(b1.dtype).itemsize
    bpo = jnp.dtype(out_dtype).itemsize

    vmem_cap = _vmem_capacity_bytes()

    # ---- M tiling: per-generation TM; aim for >=2 tiles (megacore on v7x) ----
    if tm is None:
        tm = 256 if vmem_cap <= (64 << 20) else 512
    tm_eff = min(tm, _round_up(m, 8))
    if m > 8 and m <= tm_eff:            # single tile -> split so both TCs get work
        tm_eff = _round_up(pl.cdiv(m, 2), 8)
    m_p = _round_up(m, tm_eff)
    if m_p != m:
        # TODO(synk): rely on Pallas OOB masking for the ragged last M tile
        # (rows are independent) instead of this per-call pad of x.
        x2d = jnp.pad(x2d, ((0, m_p - m), (0, 0)))

    # ---- ffn ("K") tiling: keep the full ffn resident only if it fits VMEM ----
    budget = vmem_cap - (16 << 20)       # headroom for compiler temporaries

    def _footprint(tf_eff, n_wbuf):
        weights = n_wbuf * ((hidden * tf_eff + tf_eff * out_p) * bpw + tf_eff * bpb)
        weights += out_p * bpb                                   # b2, resident
        streams = 2 * tm_eff * hidden * bpx + 2 * tm_eff * out_p * bpo
        acc = tm_eff * out_p * 4
        interm = 3 * tm_eff * tf_eff * 4                         # h, gelu(h), cast
        return weights + streams + acc + interm

    if tf is None:
        tf_eff = ffn_p if _footprint(ffn_p, 1) <= budget else _pick_tf(ffn_p, 512)
    else:
        tf_eff = min(_round_up(tf, 128), ffn_p)
        assert ffn_p % tf_eff == 0, "tf must divide the (padded) ffn dim"
    nf = ffn_p // tf_eff
    const_weights = (nf == 1)            # fetched once -> single-buffer them
    n_wbuf = 1 if const_weights else 2

    vmem_limit = int(min(max(int(1.25 * _footprint(tf_eff, n_wbuf)) + (8 << 20),
                             32 << 20),
                         vmem_cap - (8 << 20)))

    def _wspec(shape, imap):
        if const_weights:
            return pl.BlockSpec(shape, imap, pipeline_mode=pl.Buffered(1))
        return pl.BlockSpec(shape, imap)

    grid = (m_p // tm_eff, nf)

    out = pl.pallas_call(
        functools.partial(_mlp_kernel, approx_gelu=approx_gelu),
        out_shape=jax.ShapeDtypeStruct((m_p, out_p), out_dtype),
        grid_spec=pltpu.PrefetchScalarGridSpec(
            num_scalar_prefetch=0,
            grid=grid,
            in_specs=[
                # x tile: streamed over M, resident across the ffn axis.
                pl.BlockSpec((tm_eff, hidden), lambda i, f: (i, 0)),
                _wspec((hidden, tf_eff), lambda i, f: (0, f)),   # W1 column tile
                _wspec((1, tf_eff), lambda i, f: (0, f)),        # b1 tile
                _wspec((tf_eff, out_p), lambda i, f: (f, 0)),    # W2 row tile
                pl.BlockSpec((1, out_p), lambda i, f: (0, 0),
                             pipeline_mode=pl.Buffered(1)),      # b2, resident
            ],
            out_specs=pl.BlockSpec((tm_eff, out_p), lambda i, f: (i, 0)),
            scratch_shapes=[pltpu.VMEM((tm_eff, out_p), jnp.float32)],
        ),
        compiler_params=pltpu.CompilerParams(
            dimension_semantics=("parallel", "arbitrary"),
            vmem_limit_bytes=vmem_limit),
    )(x2d, w1, b1, w2, b2)

    out = out[:m, :out_dim]
    return out.reshape(*lead_shape, out_dim)


def init_params(key, hidden_size, ffn_size, output_size):
    """Deterministic init mimicking nn.Linear's uniform(-1/sqrt(fan_in), 1/sqrt(fan_in))."""
    k1, k2, k3, k4 = jax.random.split(key, 4)
    bound1 = 1.0 / math.sqrt(hidden_size)
    bound2 = 1.0 / math.sqrt(ffn_size)
    # Stored as (in_features, out_features) so the kernel computes x @ W + b
    # (equivalent to PyTorch's x @ W.T with W of shape (out, in)).
    w1 = jax.random.uniform(k1, (hidden_size, ffn_size), jnp.float32, -bound1, bound1)
    b1 = jax.random.uniform(k2, (ffn_size,), jnp.float32, -bound1, bound1)
    w2 = jax.random.uniform(k3, (ffn_size, output_size), jnp.float32, -bound2, bound2)
    b2 = jax.random.uniform(k4, (output_size,), jnp.float32, -bound2, bound2)
    return w1, b1, w2, b2


if __name__ == "__main__":
    batch, seq = 2, 8
    hidden_size, ffn_size, output_size = 32, 64, 32

    key = jax.random.PRNGKey(0)
    kx, kp = jax.random.split(key)
    x = jax.random.normal(kx, (batch, seq, hidden_size), jnp.float32)
    w1, b1, w2, b2 = init_params(kp, hidden_size, ffn_size, output_size)

    # Pure-JAX reference (Linear -> exact erf GELU -> Linear), f32.
    h_ref = x @ w1 + b1
    h_ref = 0.5 * h_ref * (1.0 + jax.lax.erf(h_ref / jnp.sqrt(2.0)))
    y_ref = h_ref @ w2 + b2

    # f32 path: strict numerical parity with the PyTorch module.
    params_f32 = prepare_params(w1, b1, w2, b2)
    y = jax.block_until_ready(mlp_layer(x, params_f32))
    assert y.shape == (batch, seq, output_size)
    assert jnp.allclose(y, y_ref, atol=1e-5, rtol=1e-5)

    # bf16 MXU-operand path (recommended on v6e/v7x); f32 accum / bias / GELU.
    params_bf16 = prepare_params(w1, b1, w2, b2, compute_dtype=jnp.bfloat16)
    y_bf16 = jax.block_until_ready(mlp_layer(x, params_bf16))
    assert y_bf16.shape == (batch, seq, output_size)
    assert jnp.allclose(y_bf16, y_ref, atol=5e-2, rtol=5e-2)

    print("KERNEL_OK")
</pallas_src>

<mosaic_0001>
module attributes {stable_mosaic.version = 11 : i64} {
  func.func @_mlp_kernel(%arg0: i32, %arg1: i32, %arg2: memref<8x32xf32, #tpu.memory_space<vmem>>, %arg3: memref<32x128xf32, #tpu.memory_space<vmem>>, %arg4: memref<1x128xf32, #tpu.memory_space<vmem>>, %arg5: memref<128x128xf32, #tpu.memory_space<vmem>>, %arg6: memref<1x128xf32, #tpu.memory_space<vmem>>, %arg7: memref<8x128xf32, #tpu.memory_space<vmem>>, %arg8: memref<8x128xf32, #tpu.memory_space<vmem>>) attributes {dimension_semantics = [#tpu.dimension_semantics<parallel>, #tpu.dimension_semantics<arbitrary>], iteration_bounds = array<i64: 2, 1>, scalar_prefetch = 0 : i64, scratch_operands = 1 : i64, tpu.core_type = #tpu.core_type<tc>, window_params = [{transform_indices = @transform_0, window_bounds = array<i64: 8, 32>}, {pipeline_mode = #tpu.pipeline_mode<synchronous>, transform_indices = @transform_1, window_bounds = array<i64: 32, 128>}, {pipeline_mode = #tpu.pipeline_mode<synchronous>, transform_indices = @transform_2, window_bounds = array<i64: 1, 128>}, {pipeline_mode = #tpu.pipeline_mode<synchronous>, transform_indices = @transform_3, window_bounds = array<i64: 128, 128>}, {pipeline_mode = #tpu.pipeline_mode<synchronous>, transform_indices = @transform_4, window_bounds = array<i64: 1, 128>}, {transform_indices = @transform_5, window_bounds = array<i64: 8, 128>}]} {
    %c0_i32 = arith.constant 0 : i32
    %0 = arith.cmpi eq, %arg1, %c0_i32 : i32
    %1 = arith.extui %0 : i1 to i32
    %c0_i32_0 = arith.constant 0 : i32
    %2 = arith.cmpi ne, %1, %c0_i32_0 : i32
    scf.if %2 {
      %cst_18 = arith.constant 0.000000e+00 : f32
      %25 = vector.broadcast %cst_18 : f32 to vector<8x128xf32>
      %c0_19 = arith.constant 0 : index
      %c0_20 = arith.constant 0 : index
      %26 = vector.load %arg8[%c0_19, %c0_20] : memref<8x128xf32, #tpu.memory_space<vmem>>, vector<8x128xf32>
      tpu.vector_store %arg8[%c0_19, %c0_20], %25 {strides = array<i32>} : memref<8x128xf32, #tpu.memory_space<vmem>>, vector<8x128xf32>,
    } else {
    }
    %c0 = arith.constant 0 : index
    %c0_1 = arith.constant 0 : index
    %3 = vector.load %arg2[%c0, %c0_1] : memref<8x32xf32, #tpu.memory_space<vmem>>, vector<8x32xf32>
    %c0_2 = arith.constant 0 : index
    %c0_3 = arith.constant 0 : index
    %4 = vector.load %arg3[%c0_2, %c0_3] : memref<32x128xf32, #tpu.memory_space<vmem>>, vector<32x128xf32>
    %cst = arith.constant dense<0.000000e+00> : vector<8x128xf32>
    %5 = tpu.matmul %3, %4, %cst {dimension_numbers = #tpu.dot_dimension_numbers<[1], [0], [0], [1], [0, 0, 1, 1], [], []>} : vector<8x32xf32>, vector<32x128xf32>, vector<8x128xf32> -> vector<8x128xf32>
    %c0_4 = arith.constant 0 : index
    %c0_5 = arith.constant 0 : index
    %6 = vector.load %arg4[%c0_4, %c0_5] : memref<1x128xf32, #tpu.memory_space<vmem>>, vector<1x128xf32>
    %7 = vector.broadcast %6 : vector<1x128xf32> to vector<8x128xf32>
    %8 = arith.addf %5, %7 : vector<8x128xf32>
    %cst_6 = arith.constant 5.000000e-01 : f32
    %9 = vector.broadcast %cst_6 : f32 to vector<8x128xf32>
    %10 = arith.mulf %9, %8 : vector<8x128xf32>
    %cst_7 = arith.constant 0.707106769 : f32
    %11 = vector.broadcast %cst_7 : f32 to vector<8x128xf32>
    %12 = arith.mulf %8, %11 : vector<8x128xf32>
    %13 = math.erf %12 : vector<8x128xf32>
    %cst_8 = arith.constant 1.000000e+00 : f32
    %14 = vector.broadcast %cst_8 : f32 to vector<8x128xf32>
    %15 = arith.addf %14, %13 : vector<8x128xf32>
    %16 = arith.mulf %10, %15 : vector<8x128xf32>
    %c0_9 = arith.constant 0 : index
    %c0_10 = arith.constant 0 : index
    %17 = vector.load %arg8[%c0_9, %c0_10] : memref<8x128xf32, #tpu.memory_space<vmem>>, vector<8x128xf32>
    %c0_11 = arith.constant 0 : index
    %c0_12 = arith.constant 0 : index
    %18 = vector.load %arg5[%c0_11, %c0_12] : memref<128x128xf32, #tpu.memory_space<vmem>>, vector<128x128xf32>
    %cst_13 = arith.constant dense<0.000000e+00> : vector<8x128xf32>
    %19 = tpu.matmul %16, %18, %cst_13 {dimension_numbers = #tpu.dot_dimension_numbers<[1], [0], [0], [1], [0, 0, 1, 1], [], []>} : vector<8x128xf32>, vector<128x128xf32>, vector<8x128xf32> -> vector<8x128xf32>
    %20 = arith.addf %17, %19 : vector<8x128xf32>
    %c0_14 = arith.constant 0 : index
    %c0_15 = arith.constant 0 : index
    %21 = vector.load %arg8[%c0_14, %c0_15] : memref<8x128xf32, #tpu.memory_space<vmem>>, vector<8x128xf32>
    tpu.vector_store %arg8[%c0_14, %c0_15], %20 {strides = array<i32>} : memref<8x128xf32, #tpu.memory_space<vmem>>, vector<8x128xf32>,
    %c0_i32_16 = arith.constant 0 : i32
    %22 = arith.cmpi eq, %arg1, %c0_i32_16 : i32
    %23 = arith.extui %22 : i1 to i32
    %c0_i32_17 = arith.constant 0 : i32
    %24 = arith.cmpi ne, %23, %c0_i32_17 : i32
    scf.if %24 {
      %c0_18 = arith.constant 0 : index
      %c0_19 = arith.constant 0 : index
      %25 = vector.load %arg8[%c0_18, %c0_19] : memref<8x128xf32, #tpu.memory_space<vmem>>, vector<8x128xf32>
      %c0_20 = arith.constant 0 : index
      %c0_21 = arith.constant 0 : index
      %26 = vector.load %arg6[%c0_20, %c0_21] : memref<1x128xf32, #tpu.memory_space<vmem>>, vector<1x128xf32>
      %27 = vector.broadcast %26 : vector<1x128xf32> to vector<8x128xf32>
      %28 = arith.addf %25, %27 : vector<8x128xf32>
      %c0_22 = arith.constant 0 : index
      %c0_23 = arith.constant 0 : index
      %29 = vector.load %arg7[%c0_22, %c0_23] : memref<8x128xf32, #tpu.memory_space<vmem>>, vector<8x128xf32>
      tpu.vector_store %arg7[%c0_22, %c0_23], %28 {strides = array<i32>} : memref<8x128xf32, #tpu.memory_space<vmem>>, vector<8x128xf32>,
    } else {
    }
    return
  }
  func.func @transform_0(%arg0: i32, %arg1: i32) -> (i32, i32) {
    %c0_i32 = arith.constant 0 : i32
    %c0_i32_0 = arith.constant 0 : i32
    return %arg0, %c0_i32 : i32, i32
  }
  func.func @transform_1(%arg0: i32, %arg1: i32) -> (i32, i32) {
    %c0_i32 = arith.constant 0 : i32
    %c0_i32_0 = arith.constant 0 : i32
    return %c0_i32, %arg1 : i32, i32
  }
  func.func @transform_2(%arg0: i32, %arg1: i32) -> (i32, i32) {
    %c0_i32 = arith.constant 0 : i32
    %c0_i32_0 = arith.constant 0 : i32
    return %c0_i32, %arg1 : i32, i32
  }
  func.func @transform_3(%arg0: i32, %arg1: i32) -> (i32, i32) {
    %c0_i32 = arith.constant 0 : i32
    %c0_i32_0 = arith.constant 0 : i32
    return %arg1, %c0_i32 : i32, i32
  }
  func.func @transform_4(%arg0: i32, %arg1: i32) -> (i32, i32) {
    %c0_i32 = arith.constant 0 : i32
    %c0_i32_0 = arith.constant 0 : i32
    %c0_i32_1 = arith.constant 0 : i32
    return %c0_i32, %c0_i32_0 : i32, i32
  }
  func.func @transform_5(%arg0: i32, %arg1: i32) -> (i32, i32) {
    %c0_i32 = arith.constant 0 : i32
    %c0_i32_0 = arith.constant 0 : i32
    return %arg0, %c0_i32 : i32, i32
  }
}

</mosaic_0001>

<bundles_post_ra>
// kernel: tpu_custom_call.1
= control target key start
LH: loop header
LB: loop body
LE: loop exit
PB: predicated region body
PF: predicated region fallthrough
CT: control target
= control target key end

     0   :  { %10 = vsyncpa [#allocation4], 0  ;;  %s1052_s0 = inlined_call_operand.hbm [shape: f32[16,32], index: 0, kind: input, shape index: {}]   ;;  %s1053_s1 = inlined_call_operand.hbm [shape: f32[32,128], index: 1, kind: input, shape index: {}]   ;;  %s1054_s2 = inlined_call_operand.vmem [shape: f32[1,128], index: 2, kind: input, shape index: {}]   ;;  %s1055_s3 = inlined_call_operand.hbm [shape: f32[128,128], index: 3, kind: input, shape index: {}]   ;;  %s1056_s4 = inlined_call_operand.vmem [shape: f32[1,128], index: 4, kind: input, shape index: {}]   ;;  %s1057_s5 = inlined_call_operand.hbm [shape: f32[16,128], index: 5, kind: output, shape index: {}]  }
   0x1   :  { %12 = vsyncpa [#allocation4 + $0x1], 0 }
   0x2   :  { %13 = vsyncpa [#allocation7], 0 }
   0x3   :  { %14 = vsyncpa [#allocation5], 0 }
   0x4   :  { %16 = vsyncpa [#allocation5 + $0x1], 0  ;;  %s898_s18 = smov 0   ;;  %s900_s19 = smov 0  }
   0x5   :  { %s902_s20 = smov 0   ;;  %s904_s21 = smov 0  }
   0x6   :  { %s906_s22 = smov 0   ;;  %s908_s23 = smov 0  }
   0x7 LB: > { %s577_s24 = sadd.s32 4294967295, %s862_s23   ;;  %p579_p0 = scmp.ge.s32.totalorder %s862_s23, 1  ;;  %s862_s23 = sphi %s908_s23, %s22_s23   ;;  %s858_s22 = sphi %s906_s22, %s1067_s22   ;;  %s854_s21 = sphi %s904_s21, %s1066_s21   ;;  %s850_s20 = sphi %s902_s20, %s1065_s20   ;;  %s846_s19 = sphi %s900_s19, %s1064_s19   ;;  %s842_s18 = sphi %s898_s18, %s1063_s18  }
   0x8   : > { %p932_p1 = scmp.eq.s32.totalorder %s577_s24, 0  ;;  %p190_p2 = scmp.lt.s32.totalorder %s862_s23, 3 }
   0x9   : > { %s203_s28 = sshll.u32 %s1053_s1, 4  ;;  %s864_s30 = smov [#allocation6]   ;;  %s204_s28 = int_to_ptr.hbm [resolvable:$true] %s203_s28 }
   0xa   : > { %p940_p3 = pnand %p579_p0, %p190_p2  ;;  %s205_s6 = sshll.u32 %s864_s30, 4  ;;  %s206_s6 = int_to_ptr.vmem [resolvable:$true] %s205_s6 }
   0xb   : > { %p583_p6 = scmp.ge.s32.totalorder %s862_s23, 2  ;;  %s226_s9 = sshll.u32 %s1055_s3, 4  ;;  %s227_s9 = int_to_ptr.hbm [resolvable:$true] %s226_s9 }
   0xc   : > { %p609_p4 = pneg %p940_p3  ;;  %s865_s10 = smov 128  }
   0xd   : > { %s866_s11 = smov 8   ;;  %s867_s12 = smov [#allocation8]  }
   0xe   : > { %p610_p5 = pnand %p609_p4, %p932_p1  ;;  %s228_s13 = sshll.u32 %s867_s12, 4  ;;  %s229_s13 = int_to_ptr.vmem [resolvable:$true] %s228_s13 }
   0xf   : > { %s34_s14 = sadd.s32 1, %s858_s22  ;;  %s578_s15 = sadd.s32 4294967294, %s862_s23  }
  0x10   : > { %612 = dma.hbm_to_vmem [thread:$0]  (!%p610_p5), %s204_s28, 512, %s206_s6, [#allocation7], %s865_s10, %s865_s10, %s866_s11  }
  0x11   : > { %615 = dma.hbm_to_vmem [thread:$0]  (!%p610_p5), %s227_s9, 2048, %s229_s13, [#allocation7], %s865_s10, %s865_s10, %s866_s11  }
  0x12   : > { %p36_p7 = scmp.ge.s32.totalorder %s34_s14, 2  ;;  %s41_s16 = sadd.s32 1, %s850_s20 }
  0x13   : > { %p48_p8 = scmp.ne.s32.totalorder %s850_s20, %s846_s19  ;;  %p49_p9 = scmp.eq.s32.totalorder %s862_s23, 0 }
  0x14   : > { %s1069_s14 = smov (%p36_p7, %s34_s14), 0  ;;  %p54_p10 = scmp.ne.s32.totalorder %s846_s19, %s842_s18 }
  0x15   : > { %s38_s17 = ssub.s32 %s858_s22, %s1069_s14  ;;  %p177_p11 = scmp.eq.s32.totalorder %s577_s24, 1 }
  0x16   : > { %p39_p12 = scmp.eq.s32.totalorder %s38_s17, 0  ;;  %p968_p13 = por %p932_p1, %p54_p10 }
  0x17   : > { %p972_p0 = por %p177_p11, %p48_p8  ;;  %p183_p2 = scmp.eq.s32.totalorder %s578_s15, 1 }
  0x18   : > { %s977_s28 = scalar_select %p39_p12, %s850_s20, %s41_s16  }
  0x19   : > { %p50_p4 = por %p49_p9, %p48_p8  ;;  %p979_p5 = por %p183_p2, %p54_p10 }
  0x1a   : > { %s245_s6 = sand.u32 1, %s850_s20   ;;  %s585_s24 = sshll.u32 %s858_s22, 3 }
  0x1b   : > { %p626_p7 = scmp.lt.s32.totalorder %s862_s23, 2  ;;  %s584_s7 = sshll.u32 %s245_s6, 3 }
  0x1c   : > { %s253_s10 = scalar_lea.hbm %s1052_s0, %s585_s24  ;;  %s249_s12 = scalar_lea.vmem [#allocation3], %s584_s7 }
  0x1d   : > { %s255_s11 = sshll.u32 %s253_s10, 4  ;;  %s257_s13 = sshll.u32 %s249_s12, 4  ;;  %s256_s11 = int_to_ptr.hbm [resolvable:$true] %s255_s11  ;;  %s258_s13 = int_to_ptr.vmem [resolvable:$true] %s257_s13 }
  0x1e   : > { %p617_p11 = pnand %p626_p7, %p50_p4  ;;  %s246_s15 = scalar_lea.sflag [#allocation4], %s245_s6 }
  0x1f   : > { %266 = sbr.rel (%p940_p3) target bundleno = 357 (0x165), region = 40  ;;  %s992_s16 = sand.u32 (!%p940_p3), 1, %s846_s19  }
  0x20   : > { %619 = dma.hbm_to_vmem [thread:$0]  (!%p617_p11), %s256_s11, 128, %s258_s13, %s246_s15  }
  0x21   : > { %s587_s17 = sshll.u32 (!%p940_p3), %s992_s16, 3  ;;  %s269_s24 = scalar_lea.sflag (!%p940_p3), [#allocation4], %s992_s16 }
  0x22   : > { %s272_s7 = scalar_lea.vmem (!%p940_p3), [#allocation3], %s587_s17 }
  0x24   : > { %829 = dma.done.wait (%p968_p13), %s269_s24, 128  }
  0x25   : > { %831 = vsyncadd (%p968_p13), %s269_s24, 4294967168 }
  0x26   : > { %833 = dma.done.wait (%p932_p1), [#allocation7], 2560  }
  0x27   : > { %835 = vsyncadd (%p932_p1), [#allocation7], 4294964736  ;;  %v326_v0 = vld [vmem:[#allocation6 + $0x18] sm:$0xff]  ;;  %v325_v1 = vld [vmem:[#allocation6 + $0x10] sm:$0xff]  ;;  %vm331_vm0 = vcmask 261120   ;;  %s594_s26 = sshll.u32 %s854_s21, 3 }
  0x28   : > { %347 = vmatpush.msra.mxu0 %v326_v0  ;;  %v324_v2 = vld [vmem:[#allocation6 + $0x8] sm:$0xff]  ;;  %v323_v3 = vld [vmem:[#allocation6] sm:$0xff]  ;;  %v322_v4 = vld [vmem:[%s272_s7] sm:$0xff]  ;;  %s459_s9 = scalar_lea.hbm %s1057_s5, %s594_s26  ;;  %s312_s12 = scalar_lea.vmem [#allocation9], %s587_s17 }
  0x29   : > { %v415_v5 = vld [vmem:[#allocation8 + $0x78] sm:$0xff]  ;;  %v414_v6 = vld [vmem:[#allocation8 + $0x70] sm:$0xff]  ;;  %v413_v7 = vld [vmem:[#allocation8 + $0x68] sm:$0xff]  ;;  %s461_s13 = sshll.u32 %s312_s12, 4  ;;  %s463_s15 = sshll.u32 %s459_s9, 4  ;;  %s462_s13 = int_to_ptr.vmem [resolvable:$true] %s461_s13  ;;  %s464_s15 = int_to_ptr.hbm [resolvable:$true] %s463_s15 }
  0x2a   : > { %348 = vmatpush.msra.mxu0 %v325_v1  ;;  %416 = vmatpush.msra.mxu1 %v415_v5  ;;  %v412_v8 = vld [vmem:[#allocation8 + $0x60] sm:$0xff]  ;;  %v682_v9 = vld [vmem:[%s1054_s2] ss:$0 sm:$0xff]  ;;  %v411_v10 = vld [vmem:[#allocation8 + $0x58] sm:$0xff]  ;;  %s449_s24 = scalar_lea.sflag [#allocation5], %s992_s16  ;;  %s790_s21 = sshra.s32 %s464_s15, 4  ;;  %s791_s21 = int_to_ptr.hbm [resolvable:$true] %s790_s21 }
  0x2b   : > { %v410_v11 = vld [vmem:[#allocation8 + $0x50] sm:$0xff]  ;;  %v409_v13 = vld [vmem:[#allocation8 + $0x48] sm:$0xff]  ;;  %v408_v15 = vld [vmem:[#allocation8 + $0x40] sm:$0xff]  ;;  %s792_s7 = scalar_lea.hbm %s791_s21, 8  ;;  %s796_s26 = scalar_lea.hbm %s1057_s5, 16 }
  0x2c   : > { %349 = vmatpush.msra.mxu0 %v324_v2  ;;  %417 = vmatpush.msra.mxu1 %v414_v6  ;;  %v407_v17 = vld [vmem:[#allocation8 + $0x38] sm:$0xff]  ;;  %v406_v19 = vld [vmem:[#allocation8 + $0x30] sm:$0xff]  ;;  %v405_v21 = vld [vmem:[#allocation8 + $0x28] sm:$0xff]  ;;  %p793_p1 = scmp.ne.s32.totalorder %s791_s21, %s792_s7  ;;  %p797_p9 = scmp.lt.s32.totalorder %s791_s21, %s1057_s5 }
  0x2d   : > { %v404_v24 = vld [vmem:[#allocation8 + $0x20] sm:$0xff]  ;;  %v403_v27 = vld [vmem:[#allocation8 + $0x18] sm:$0xff]  ;;  %v402_v30 = vld [vmem:[#allocation8 + $0x10] sm:$0xff]  ;;  %p798_p10 = scmp.lt.s32.totalorder %s796_s26, %s792_s7 }
  0x2e   : > { %350 = vmatpush.msra.mxu0 %v323_v3  ;;  %418 = vmatpush.msra.mxu1 %v413_v7  ;;  %v401_v33 = vld [vmem:[#allocation8 + $0x8] sm:$0xff]  ;;  %v400_v35 = vld [vmem:[#allocation8] sm:$0xff]  ;;  %v683_v63 = vld [vmem:[%s1056_s4] ss:$0 sm:$0xff]  ;;  %p794_p3 = pnand %p793_p1, %p972_p0 }
  0x2f   : > { %591 = vmatmul.msk.f32.vlgmr.msra.gmra.mxu0 %vm331_vm0, %v322_v4  ;;  %p799_p12 = por %p798_p10, %p797_p9 }
  0x30   : > { %419 = vmatpush.msra.mxu1 %v412_v8  ;;  %p795_p8 = pneg %p794_p3 }
  0x32   : > { %420 = vmatpush.msra.mxu1 %v411_v10  ;;  %p800_p13 = pnand %p799_p12, %p795_p8 }
  0x34   : > { %421 = vmatpush.msra.mxu1 %v410_v11 }
  0x36   : > { %422 = vmatpush.msra.mxu1 %v409_v13 }
  0x38   : > { %423 = vmatpush.msra.mxu1 %v408_v15 }
  0x3a   : > { %424 = vmatpush.msra.mxu1 %v407_v17 }
  0x3c   : > { %425 = vmatpush.msra.mxu1 %v406_v19 }
  0x3e   : > { %426 = vmatpush.msra.mxu1 %v405_v21 }
  0x40   : > { %427 = vmatpush.msra.mxu1 %v404_v24 }
  0x42   : > { %428 = vmatpush.msra.mxu1 %v403_v27 }
  0x44   : > { %429 = vmatpush.msra.mxu1 %v402_v30 }
  0x46   : > { %430 = vmatpush.msra.mxu1 %v401_v33 }
  0x48   : > { %431 = vmatpush.msra.mxu1 %v400_v35 }
  0xac   : > { %v352_v12 = vpop.f32.mrf.mxu0 }
  0xad   : > { %v353_v14 = vadd.f32 %v682_v9, %v352_v12 }
  0xaf   : > { %v356_v16 = vmul.f32 0.70710677, %v353_v14  ;;  %v355_v60 = vmul.f32 0.5, %v353_v14 }
  0xb1   : > { %v357_v18 = vmul.f32 %v356_v16, %v356_v16 }
  0xb3   : > { %v358_v20 = vmin.f32 %v357_v18, 16.0 }
  0xb5   : > { %v359_v22 = vmul.f32 2.1237322e-06, %v358_v20  ;;  %v370_v23 = vmul.f32 3.8918573e-05, %v358_v20 }
  0xb7   : > { %v360_v25 = vadd.f32 0.00028619796, %v359_v22  ;;  %v371_v26 = vadd.f32 0.001143296, %v370_v23 }
  0xb9   : > { %v361_v28 = vmul.f32 %v360_v25, %v358_v20  ;;  %v372_v29 = vmul.f32 %v371_v26, %v358_v20 }
  0xbb   : > { %v373_v31 = vadd.f32 0.014752088, %v372_v29  ;;  %v362_v32 = vadd.f32 0.0036580483, %v361_v28 }
  0xbd   : > { %v374_v34 = vmul.f32 %v373_v31, %v358_v20  ;;  %v363_v37 = vmul.f32 %v362_v32, %v358_v20 }
  0xbf   : > { %v375_v36 = vadd.f32 0.112945676, %v374_v34  ;;  %v364_v40 = vadd.f32 0.05243302, %v363_v37 }
  0xc1   : > { %v376_v38 = vmul.f32 %v375_v36, %v358_v20  ;;  %v365_v43 = vmul.f32 %v364_v40, %v358_v20 }
  0xc3   : > { %v377_v39 = vadd.f32 0.4994258, %v376_v38  ;;  %v366_v44 = vadd.f32 0.18741608, %v365_v43 }
  0xc5   : > { %v378_v41 = vmul.f32 %v377_v39, %v358_v20  ;;  %v367_v46 = vmul.f32 %v366_v44, %v358_v20 }
  0xc7   : > { %v379_v42 = vadd.f32 1.0, %v378_v41  ;;  %v368_v50 = vadd.f32 1.1283791, %v367_v46 }
  0xc9   : > { %684 = vrcp.f32 %v379_v42  ;;  %v391_v49 = vand.u32 2147483648, %v379_v42  ;;  %v389_v52 = vand.u32 2147483647, %v379_v42  ;;  %vm385_vm2 = vweird.f32 %v379_v42 }
  0xca   : > { %v369_v55 = vmul.f32 %v368_v50, %v356_v16 }
  0xcb   : > { %v392_v54 = vor.u32 1.1754944e-38, %v391_v49  ;;  %vm390_vm4 = vcmp.eq.f32.partialorder %v389_v52, 8.507059e+37 }
  0xcf   : > { %v685_v45 = vpop.eup %684 }
  0xd0   : > { %v381_v47 = vmul.f32 %v685_v45, %v379_v42  ;;  %vm386_vm1 = vweird.f32 %v685_v45 }
  0xd1   : > { %vm387_vm3 = vmor %vm385_vm2, %vm386_vm1 }
  0xd2   : > { %v382_v48 = vsub.f32 1.0, %v381_v47 }
  0xd4   : > { %v383_v51 = vmul.f32 %v685_v45, %v382_v48 }
  0xd6   : > { %v384_v53 = vadd.f32 %v685_v45, %v383_v51 }
  0xd8   : > { %v388_v56 = vsel %vm387_vm3, %v685_v45, %v384_v53 }
  0xd9   : > { %v393_v57 = vsel %vm390_vm4, %v392_v54, %v388_v56 }
  0xda   : > { %v394_v58 = vmul.f32 %v393_v57, %v369_v55 }
  0xdc   : > { %v592_v59 = vclamps-f32 %v394_v58, 1.0 }
  0xde   : > { %v397_v61 = vadd.f32 1.0, %v592_v59 }
  0xe0   : > { %v398_v62 = vmul.f32 %v397_v61, %v355_v60 }
  0xe2   : > { %432 = vmatmul.f32.vlgmr.msra.gmra.mxu1 %v398_v62 }
 0x15f   : > { %v433_v0 = vpop.f32.mrf.mxu1 }
 0x160   : > { %v446_v1 = vadd.f32 %v683_v63, %v433_v0 }
 0x162   : > { %447 = vst [vmem:[%s312_s12] sm:$0xff] %v446_v1 }
 0x163   : > { %803 = shalt.err (!%p800_p13)
}
 0x164   : > { %607 = dma.vmem_to_hbm [thread:$0]  (%p972_p0), %s462_s13, 128, %s464_s15, %s449_s24  }
 0x165 PF: > { %s475_s16 = sand.u32 1, %s842_s18   ;;  %p621_p2 = pnand %p583_p6, %p979_p5 }
 0x166   : > { %s476_s8 = scalar_lea.sflag [#allocation5], %s475_s16 }
 0x167   : > { %p622_p4 = pneg %p621_p2 }
 0x169   : > { %837 = dma.done.wait (%p622_p4), %s476_s8, 128  }
 0x16a   : > { %839 = vsyncadd (%p622_p4), %s476_s8, 4294967168  ;;  %s22_s23 = sadd.s32 1, %s862_s23   ;;  %s1063_s18 = smov %s846_s19 }
 0x16b   : > { %p19_p7 = scmp.ge.s32.totalorder %s22_s23, 4   ;;  %s1064_s19 = smov %s850_s20 }
 0x16c   : > { %s1065_s20 = smov %s977_s28  ;;  %s1066_s21 = smov %s858_s22 }
 0x16d   : > { %s1067_s22 = smov %s1069_s14  ;;  %21 = sbr.rel (!%p19_p7) target bundleno = 7 (0x7), region = 106 }
 0x172   :  { %482 = vsyncpa [#allocation4], 1 }
 0x173   :  { %484 = vsyncpa [#allocation4 + $0x1], 1 }
 0x174   :  { %485 = vsyncpa [#allocation7], 1 }
 0x175   :  { %486 = vsyncpa [#allocation5], 1 }
 0x176   :  { %488 = vsyncpa [#allocation5 + $0x1], 1 }

</bundles_post_ra>
